<compile_context>
chip_gen: v6e
topology: v6e:2x2x1
jax: 0.10.0
libtpu: 0.0.40
codegen_flags: <defaults>
</compile_context>

<pallas_src>
import functools
import math

import jax
import jax.numpy as jnp
from jax.experimental import pallas as pl
from jax.experimental.pallas import tpu as pltpu


# ---------------------------------------------------------------------------
# Kernel
# ---------------------------------------------------------------------------
def simple_gate_kernel(x_ref, g_ref, b_ref,
                       w4a_ref, b4a_ref, w4b_ref, b4b_ref,
                       w5_ref, b5_ref, out_ref, *, eps):
    """One (batch, pixel-tile) block of SimpleGate, channels on sublanes.

    x_ref   : (C, TP)        input pixels, channel-major (native NCHW view)
    g_ref   : (C, 1)   f32   LayerNorm2d weight
    b_ref   : (C, 1)   f32   LayerNorm2d bias
    w4a_ref : (c, C)   bf16  conv4 weight, first half of output channels
    b4a_ref : (c, 1)   f32
    w4b_ref : (c, C)   bf16  conv4 weight, second half of output channels
    b4b_ref : (c, 1)   f32
    w5_ref  : (C, c)   bf16  conv5 weight
    b5_ref  : (C, 1)   f32
    out_ref : (C, TP)
    """
    x = x_ref[...].astype(jnp.float32)                  # (C, TP)

    # --- LayerNorm2d: per-pixel stats over the channel (sublane) axis -------
    mu = jnp.mean(x, axis=0, keepdims=True)             # (1, TP)
    xc = x - mu
    var = jnp.mean(xc * xc, axis=0, keepdims=True)
    y = xc * jax.lax.rsqrt(var + eps)                   # EUP rsqrt
    y = y * g_ref[...] + b_ref[...]                     # fused scale/shift

    # --- conv4 (1x1) split into the two gate halves: no sublane slicing -----
    y16 = y.astype(w4a_ref.dtype)
    h1 = jnp.dot(w4a_ref[...], y16, preferred_element_type=jnp.float32)
    h1 = h1 + b4a_ref[...]
    h2 = jnp.dot(w4b_ref[...], y16, preferred_element_type=jnp.float32)
    h2 = h2 + b4b_ref[...]

    # --- SimpleGate: x1 * x2 -------------------------------------------------
    gated = h1 * h2                                      # (c, TP), f32

    # --- conv5 (1x1) ---------------------------------------------------------
    out = jnp.dot(w5_ref[...], gated.astype(w5_ref.dtype),
                  preferred_element_type=jnp.float32)
    out = out + b5_ref[...]

    out_ref[...] = out.astype(out_ref.dtype)


# ---------------------------------------------------------------------------
# Wrapper: native NCHW view (N, C, H*W), grid over (batch, pixel tiles)
# ---------------------------------------------------------------------------
def _pick_pixel_tile(hw, c, itemsize, target_bytes):
    """Largest pixel tile that (a) is a multiple of 128, (b) divides hw, and
    (c) keeps the per-step x block near target_bytes.  Falls back to the whole
    pixel axis when hw is not a multiple of 128 (full-dim blocks are legal)."""
    if hw % 128 != 0:
        return hw
    per_pixel = max(c, 8) * itemsize                 # sublane padding to >= 8
    tp = max(128, (target_bytes // per_pixel) // 128 * 128)
    tp = min(tp, hw)
    while hw % tp != 0:                              # terminates at tp == 128
        tp -= 128
    return tp


def simple_gate(x_nchw, ln_gamma, ln_beta, w4, b4, w5, b5, *,
                eps=1e-6, pixel_block=None, target_block_bytes=2 << 20,
                compute_dtype=jnp.bfloat16):
    """SimpleGate forward.  x_nchw: (N, C, H, W).  Weights in PyTorch layout:
       w4: (2c, C), b4: (2c,), w5: (C, c), b5: (C,).  Output dtype == input."""
    N, C, H, W = x_nchw.shape
    ffn = w4.shape[0]
    assert ffn % 2 == 0, "conv4 output channels must be even for the gate chunk"
    c_mid = ffn // 2
    c_out = w5.shape[0]
    assert w4.shape[1] == C and w5.shape[1] == c_mid and c_out == C

    hw = H * W
    x = x_nchw.reshape(N, C, hw)                     # free reshape, native layout
    itemsize = jnp.dtype(x.dtype).itemsize

    # Pixel (lane) tile: multiple of 128, divides hw -> no pad/slice round trip.
    if pixel_block is not None:
        tp = min(int(pixel_block), hw)
        if hw % 128 == 0:
            tp = max(128, (tp // 128) * 128)
            while hw % tp != 0:
                tp -= 128
        else:
            tp = hw
    else:
        tp = _pick_pixel_tile(hw, C, itemsize, target_block_bytes)

    # Weight prep (tiny, done once in JAX): split conv4 into gate halves, keep
    # the PyTorch (out, in) layout (exactly what w @ x needs), bf16 matmul
    # operands, column-vector biases / LN params for lane broadcast.
    w4a = w4[:c_mid].astype(compute_dtype)                     # (c, C)
    w4b = w4[c_mid:].astype(compute_dtype)                     # (c, C)
    b4a = b4[:c_mid].reshape(c_mid, 1).astype(jnp.float32)
    b4b = b4[c_mid:].reshape(c_mid, 1).astype(jnp.float32)
    w5c = w5.astype(compute_dtype)                             # (C, c)
    b5c = b5.reshape(c_out, 1).astype(jnp.float32)
    g_c = ln_gamma.reshape(C, 1).astype(jnp.float32)
    be_c = ln_beta.reshape(C, 1).astype(jnp.float32)

    grid = (N, hw // tp)
    const = lambda n, p: (0, 0)
    sq = pl.Squeezed()

    # VMEM estimate: double-buffered x/out blocks plus f32 temporaries
    # (sublane-padded to 8 rows).  Cap comfortably below v7x's 64 MiB physical
    # VMEM; v5e/v6e have 128 MiB physical, so the same cap is safe there too.
    sub8 = lambda c: -(-max(c, 8) // 8) * 8
    blk_io = sub8(C) * tp * itemsize
    blk_f32 = sub8(C) * tp * 4
    blk_mid = sub8(c_mid) * tp * 4
    vmem_est = 4 * blk_io + 6 * blk_f32 + 3 * blk_mid
    vmem_limit = int(min(max(2 * vmem_est, 32 << 20), 48 << 20))

    out = pl.pallas_call(
        functools.partial(simple_gate_kernel, eps=eps),
        out_shape=jax.ShapeDtypeStruct((N, c_out, hw), x.dtype),
        grid=grid,
        in_specs=[
            pl.BlockSpec((sq, C, tp), lambda n, p: (n, 0, p)),    # x pixels
            pl.BlockSpec((C, 1), const),                          # ln gamma
            pl.BlockSpec((C, 1), const),                          # ln beta
            pl.BlockSpec((c_mid, C), const),                      # w4a
            pl.BlockSpec((c_mid, 1), const),                      # b4a
            pl.BlockSpec((c_mid, C), const),                      # w4b
            pl.BlockSpec((c_mid, 1), const),                      # b4b
            pl.BlockSpec((c_out, c_mid), const),                  # w5
            pl.BlockSpec((c_out, 1), const),                      # b5
        ],
        out_specs=pl.BlockSpec((sq, c_out, tp), lambda n, p: (n, 0, p)),
        compiler_params=pltpu.CompilerParams(
            dimension_semantics=("parallel", "parallel"),
            vmem_limit_bytes=vmem_limit),
    )(x, g_c, be_c, w4a, b4a, w4b, b4b, w5c, b5c)

    return out.reshape(N, c_out, H, W)


# ---------------------------------------------------------------------------
# Pure-JAX (f32) reference for correctness checking
# ---------------------------------------------------------------------------
def _ref_simple_gate(x_nchw, ln_gamma, ln_beta, w4, b4, w5, b5, eps=1e-6):
    N, C, H, W = x_nchw.shape
    mu = x_nchw.mean(axis=1, keepdims=True)
    var = ((x_nchw - mu) ** 2).mean(axis=1, keepdims=True)
    y = (x_nchw - mu) / jnp.sqrt(var + eps)
    y = y * ln_gamma.reshape(1, C, 1, 1) + ln_beta.reshape(1, C, 1, 1)
    h = jnp.einsum("nchw,oc->nohw", y, w4) + b4.reshape(1, -1, 1, 1)
    c_mid = h.shape[1] // 2
    g = h[:, :c_mid] * h[:, c_mid:]
    out = jnp.einsum("nchw,oc->nohw", g, w5) + b5.reshape(1, -1, 1, 1)
    return out


if __name__ == "__main__":
    key = jax.random.PRNGKey(0)
    kx, kw4, kb4, kw5, kb5 = jax.random.split(key, 5)

    # SimpleGate(c=4, FFN_Expand=2) on a 2x4x16x16 input.
    N, C, H, W = 2, 4, 16, 16
    ffn = 2 * C

    x = jax.random.normal(kx, (N, C, H, W), jnp.float32)

    # LayerNorm2d params (default init: ones / zeros).
    ln_gamma = jnp.ones((C,), jnp.float32)
    ln_beta = jnp.zeros((C,), jnp.float32)

    # Conv 1x1 weights/biases, PyTorch-default-style uniform init.
    bound4 = 1.0 / math.sqrt(C)
    w4 = jax.random.uniform(kw4, (ffn, C), jnp.float32, -bound4, bound4)
    b4 = jax.random.uniform(kb4, (ffn,), jnp.float32, -bound4, bound4)
    bound5 = 1.0 / math.sqrt(ffn // 2)
    w5 = jax.random.uniform(kw5, (C, ffn // 2), jnp.float32, -bound5, bound5)
    b5 = jax.random.uniform(kb5, (C,), jnp.float32, -bound5, bound5)

    # pixel_block=128 -> grid (2, 2) over the 2 x 256 pixels (exercises both
    # grid axes and the software pipeline at this small test size).
    out = simple_gate(x, ln_gamma, ln_beta, w4, b4, w5, b5, pixel_block=128)
    out = jax.block_until_ready(out)
    assert out.shape == (N, C, H, W)
    assert bool(jnp.all(jnp.isfinite(out)))

    ref = jax.block_until_ready(
        _ref_simple_gate(x, ln_gamma, ln_beta, w4, b4, w5, b5))
    assert jnp.allclose(out, ref, atol=2e-2, rtol=2e-2), (
        "Pallas SimpleGate mismatch vs reference")

    print("KERNEL_OK")
</pallas_src>

<mosaic_0001>
module attributes {stable_mosaic.version = 11 : i64} {
  func.func @simple_gate_kernel(%arg0: i32, %arg1: i32, %arg2: memref<1x4x128xf32, #tpu.memory_space<vmem>>, %arg3: memref<4x1xf32, #tpu.memory_space<vmem>>, %arg4: memref<4x1xf32, #tpu.memory_space<vmem>>, %arg5: memref<4x4xbf16, #tpu.memory_space<vmem>>, %arg6: memref<4x1xf32, #tpu.memory_space<vmem>>, %arg7: memref<4x4xbf16, #tpu.memory_space<vmem>>, %arg8: memref<4x1xf32, #tpu.memory_space<vmem>>, %arg9: memref<4x4xbf16, #tpu.memory_space<vmem>>, %arg10: memref<4x1xf32, #tpu.memory_space<vmem>>, %arg11: memref<1x4x128xf32, #tpu.memory_space<vmem>>) attributes {dimension_semantics = [#tpu.dimension_semantics<parallel>, #tpu.dimension_semantics<parallel>], iteration_bounds = array<i64: 2, 2>, scalar_prefetch = 0 : i64, scratch_operands = 0 : i64, tpu.core_type = #tpu.core_type<tc>, window_params = [{transform_indices = @transform_0, window_bounds = array<i64: 1, 4, 128>}, {pipeline_mode = #tpu.pipeline_mode<synchronous>, transform_indices = @transform_1, window_bounds = array<i64: 4, 1>}, {pipeline_mode = #tpu.pipeline_mode<synchronous>, transform_indices = @transform_2, window_bounds = array<i64: 4, 1>}, {pipeline_mode = #tpu.pipeline_mode<synchronous>, transform_indices = @transform_3, window_bounds = array<i64: 4, 4>}, {pipeline_mode = #tpu.pipeline_mode<synchronous>, transform_indices = @transform_4, window_bounds = array<i64: 4, 1>}, {pipeline_mode = #tpu.pipeline_mode<synchronous>, transform_indices = @transform_5, window_bounds = array<i64: 4, 4>}, {pipeline_mode = #tpu.pipeline_mode<synchronous>, transform_indices = @transform_6, window_bounds = array<i64: 4, 1>}, {pipeline_mode = #tpu.pipeline_mode<synchronous>, transform_indices = @transform_7, window_bounds = array<i64: 4, 4>}, {pipeline_mode = #tpu.pipeline_mode<synchronous>, transform_indices = @transform_8, window_bounds = array<i64: 4, 1>}, {transform_indices = @transform_9, window_bounds = array<i64: 1, 4, 128>}]} {
    %c0 = arith.constant 0 : index
    %c0_0 = arith.constant 0 : index
    %c0_1 = arith.constant 0 : index
    %0 = vector.load %arg2[%c0, %c0_0, %c0_1] : memref<1x4x128xf32, #tpu.memory_space<vmem>>, vector<1x4x128xf32>
    %1 = vector.shape_cast %0 : vector<1x4x128xf32> to vector<4x128xf32>
    %cst = arith.constant dense<0.000000e+00> : vector<128xf32>
    %2 = vector.multi_reduction <add>, %1, %cst [0] : vector<4x128xf32> to vector<128xf32>
    %3 = vector.shape_cast %2 : vector<128xf32> to vector<1x128xf32>
    %cst_2 = arith.constant 4.000000e+00 : f32
    %4 = vector.broadcast %cst_2 : f32 to vector<1x128xf32>
    %5 = arith.divf %3, %4 : vector<1x128xf32>
    %6 = vector.broadcast %5 : vector<1x128xf32> to vector<4x128xf32>
    %7 = arith.subf %1, %6 : vector<4x128xf32>
    %8 = arith.mulf %7, %7 : vector<4x128xf32>
    %cst_3 = arith.constant dense<0.000000e+00> : vector<128xf32>
    %9 = vector.multi_reduction <add>, %8, %cst_3 [0] : vector<4x128xf32> to vector<128xf32>
    %10 = vector.shape_cast %9 : vector<128xf32> to vector<1x128xf32>
    %cst_4 = arith.constant 4.000000e+00 : f32
    %11 = vector.broadcast %cst_4 : f32 to vector<1x128xf32>
    %12 = arith.divf %10, %11 : vector<1x128xf32>
    %cst_5 = arith.constant 9.99999997E-7 : f32
    %13 = vector.broadcast %cst_5 : f32 to vector<1x128xf32>
    %14 = arith.addf %12, %13 : vector<1x128xf32>
    %15 = math.rsqrt %14 : vector<1x128xf32>
    %16 = vector.broadcast %15 : vector<1x128xf32> to vector<4x128xf32>
    %17 = arith.mulf %7, %16 : vector<4x128xf32>
    %c0_6 = arith.constant 0 : index
    %c0_7 = arith.constant 0 : index
    %18 = vector.load %arg3[%c0_6, %c0_7] : memref<4x1xf32, #tpu.memory_space<vmem>>, vector<4x1xf32>
    %19 = vector.broadcast %18 : vector<4x1xf32> to vector<4x128xf32>
    %20 = arith.mulf %17, %19 : vector<4x128xf32>
    %c0_8 = arith.constant 0 : index
    %c0_9 = arith.constant 0 : index
    %21 = vector.load %arg4[%c0_8, %c0_9] : memref<4x1xf32, #tpu.memory_space<vmem>>, vector<4x1xf32>
    %22 = vector.broadcast %21 : vector<4x1xf32> to vector<4x128xf32>
    %23 = arith.addf %20, %22 : vector<4x128xf32>
    %24 = arith.truncf %23 : vector<4x128xf32> to vector<4x128xbf16>
    %c0_10 = arith.constant 0 : index
    %c0_11 = arith.constant 0 : index
    %25 = vector.load %arg5[%c0_10, %c0_11] : memref<4x4xbf16, #tpu.memory_space<vmem>>, vector<4x4xbf16>
    %cst_12 = arith.constant dense<0.000000e+00> : vector<4x128xf32>
    %26 = tpu.matmul %25, %24, %cst_12 {dimension_numbers = #tpu.dot_dimension_numbers<[1], [0], [0], [1], [0, 0, 1, 1], [], []>} : vector<4x4xbf16>, vector<4x128xbf16>, vector<4x128xf32> -> vector<4x128xf32>
    %c0_13 = arith.constant 0 : index
    %c0_14 = arith.constant 0 : index
    %27 = vector.load %arg6[%c0_13, %c0_14] : memref<4x1xf32, #tpu.memory_space<vmem>>, vector<4x1xf32>
    %28 = vector.broadcast %27 : vector<4x1xf32> to vector<4x128xf32>
    %29 = arith.addf %26, %28 : vector<4x128xf32>
    %c0_15 = arith.constant 0 : index
    %c0_16 = arith.constant 0 : index
    %30 = vector.load %arg7[%c0_15, %c0_16] : memref<4x4xbf16, #tpu.memory_space<vmem>>, vector<4x4xbf16>
    %cst_17 = arith.constant dense<0.000000e+00> : vector<4x128xf32>
    %31 = tpu.matmul %30, %24, %cst_17 {dimension_numbers = #tpu.dot_dimension_numbers<[1], [0], [0], [1], [0, 0, 1, 1], [], []>} : vector<4x4xbf16>, vector<4x128xbf16>, vector<4x128xf32> -> vector<4x128xf32>
    %c0_18 = arith.constant 0 : index
    %c0_19 = arith.constant 0 : index
    %32 = vector.load %arg8[%c0_18, %c0_19] : memref<4x1xf32, #tpu.memory_space<vmem>>, vector<4x1xf32>
    %33 = vector.broadcast %32 : vector<4x1xf32> to vector<4x128xf32>
    %34 = arith.addf %31, %33 : vector<4x128xf32>
    %35 = arith.mulf %29, %34 : vector<4x128xf32>
    %c0_20 = arith.constant 0 : index
    %c0_21 = arith.constant 0 : index
    %36 = vector.load %arg9[%c0_20, %c0_21] : memref<4x4xbf16, #tpu.memory_space<vmem>>, vector<4x4xbf16>
    %37 = arith.truncf %35 : vector<4x128xf32> to vector<4x128xbf16>
    %cst_22 = arith.constant dense<0.000000e+00> : vector<4x128xf32>
    %38 = tpu.matmul %36, %37, %cst_22 {dimension_numbers = #tpu.dot_dimension_numbers<[1], [0], [0], [1], [0, 0, 1, 1], [], []>} : vector<4x4xbf16>, vector<4x128xbf16>, vector<4x128xf32> -> vector<4x128xf32>
    %c0_23 = arith.constant 0 : index
    %c0_24 = arith.constant 0 : index
    %39 = vector.load %arg10[%c0_23, %c0_24] : memref<4x1xf32, #tpu.memory_space<vmem>>, vector<4x1xf32>
    %40 = vector.broadcast %39 : vector<4x1xf32> to vector<4x128xf32>
    %41 = arith.addf %38, %40 : vector<4x128xf32>
    %c0_25 = arith.constant 0 : index
    %c0_26 = arith.constant 0 : index
    %c0_27 = arith.constant 0 : index
    %42 = vector.load %arg11[%c0_25, %c0_26, %c0_27] : memref<1x4x128xf32, #tpu.memory_space<vmem>>, vector<1x4x128xf32>
    %43 = vector.shape_cast %42 : vector<1x4x128xf32> to vector<4x128xf32>
    %44 = vector.shape_cast %41 : vector<4x128xf32> to vector<1x4x128xf32>
    tpu.vector_store %arg11[%c0_25, %c0_26, %c0_27], %44 {strides = array<i32>} : memref<1x4x128xf32, #tpu.memory_space<vmem>>, vector<1x4x128xf32>,
    return
  }
  func.func @transform_0(%arg0: i32, %arg1: i32) -> (i32, i32, i32) {
    %c0_i32 = arith.constant 0 : i32
    %c0_i32_0 = arith.constant 0 : i32
    return %arg0, %c0_i32, %arg1 : i32, i32, i32
  }
  func.func @transform_1(%arg0: i32, %arg1: i32) -> (i32, i32) {
    %c0_i32 = arith.constant 0 : i32
    %c0_i32_0 = arith.constant 0 : i32
    %c0_i32_1 = arith.constant 0 : i32
    return %c0_i32, %c0_i32_0 : i32, i32
  }
  func.func @transform_2(%arg0: i32, %arg1: i32) -> (i32, i32) {
    %c0_i32 = arith.constant 0 : i32
    %c0_i32_0 = arith.constant 0 : i32
    %c0_i32_1 = arith.constant 0 : i32
    return %c0_i32, %c0_i32_0 : i32, i32
  }
  func.func @transform_3(%arg0: i32, %arg1: i32) -> (i32, i32) {
    %c0_i32 = arith.constant 0 : i32
    %c0_i32_0 = arith.constant 0 : i32
    %c0_i32_1 = arith.constant 0 : i32
    return %c0_i32, %c0_i32_0 : i32, i32
  }
  func.func @transform_4(%arg0: i32, %arg1: i32) -> (i32, i32) {
    %c0_i32 = arith.constant 0 : i32
    %c0_i32_0 = arith.constant 0 : i32
    %c0_i32_1 = arith.constant 0 : i32
    return %c0_i32, %c0_i32_0 : i32, i32
  }
  func.func @transform_5(%arg0: i32, %arg1: i32) -> (i32, i32) {
    %c0_i32 = arith.constant 0 : i32
    %c0_i32_0 = arith.constant 0 : i32
    %c0_i32_1 = arith.constant 0 : i32
    return %c0_i32, %c0_i32_0 : i32, i32
  }
  func.func @transform_6(%arg0: i32, %arg1: i32) -> (i32, i32) {
    %c0_i32 = arith.constant 0 : i32
    %c0_i32_0 = arith.constant 0 : i32
    %c0_i32_1 = arith.constant 0 : i32
    return %c0_i32, %c0_i32_0 : i32, i32
  }
  func.func @transform_7(%arg0: i32, %arg1: i32) -> (i32, i32) {
    %c0_i32 = arith.constant 0 : i32
    %c0_i32_0 = arith.constant 0 : i32
    %c0_i32_1 = arith.constant 0 : i32
    return %c0_i32, %c0_i32_0 : i32, i32
  }
  func.func @transform_8(%arg0: i32, %arg1: i32) -> (i32, i32) {
    %c0_i32 = arith.constant 0 : i32
    %c0_i32_0 = arith.constant 0 : i32
    %c0_i32_1 = arith.constant 0 : i32
    return %c0_i32, %c0_i32_0 : i32, i32
  }
  func.func @transform_9(%arg0: i32, %arg1: i32) -> (i32, i32, i32) {
    %c0_i32 = arith.constant 0 : i32
    %c0_i32_0 = arith.constant 0 : i32
    return %arg0, %c0_i32, %arg1 : i32, i32, i32
  }
}

</mosaic_0001>

<bundles_post_ra>
// kernel: tpu_custom_call.1
= control target key start
LH: loop header
LB: loop body
LE: loop exit
PB: predicated region body
PF: predicated region fallthrough
CT: control target
= control target key end

     0   :  { %s1085_s0 = inlined_call_operand.vmem [shape: f32[2,4,256], index: 0, kind: input, shape index: {}]   ;;  %s1086_s1 = inlined_call_operand.vmem [shape: f32[4,1], index: 1, kind: input, shape index: {}]   ;;  %s1087_s2 = inlined_call_operand.vmem [shape: f32[4,1], index: 2, kind: input, shape index: {}]   ;;  %s1088_s3 = inlined_call_operand.vmem [shape: bf16[4,4], index: 3, kind: input, shape index: {}]   ;;  %s1089_s4 = inlined_call_operand.vmem [shape: f32[4,1], index: 4, kind: input, shape index: {}]   ;;  %s1090_s5 = inlined_call_operand.vmem [shape: bf16[4,4], index: 5, kind: input, shape index: {}]   ;;  %s1091_s6 = inlined_call_operand.vmem [shape: f32[4,1], index: 6, kind: input, shape index: {}]   ;;  %s1092_s7 = inlined_call_operand.vmem [shape: bf16[4,4], index: 7, kind: input, shape index: {}]   ;;  %s1093_s8 = inlined_call_operand.vmem [shape: f32[4,1], index: 8, kind: input, shape index: {}]   ;;  %s1094_s9 = inlined_call_operand.hbm [shape: f32[2,4,256], index: 9, kind: output, shape index: {}]  }
   0x1   :  { %1096 = sst [smem:[#allocation6_spill]] %s1086_s1 }
   0x2   :  { %1097 = sst [smem:[#allocation7_spill]] %s1087_s2 }
   0x3   :  { %1098 = sst [smem:[#allocation8_spill]] %s1093_s8 }
   0x4   :  { %14 = vsyncpa [#allocation3], 0 }
   0x5   :  { %16 = vsyncpa [#allocation3 + $0x1], 0  ;;  %s917_s30 = smov 0   ;;  %s919_s10 = smov 0  }
   0x6   :  { %s921_s11 = smov 0   ;;  %s923_s12 = smov 0  }
   0x7   :  { %s925_s13 = smov 0   ;;  %s927_s14 = smov 0  }
   0x8   :  { %s929_s15 = smov 0   ;;  %s931_s16 = smov 0  }
   0x9 LB: > { %s651_s17 = sadd.s32 4294967295, %s861_s16   ;;  %s652_s18 = sadd.s32 4294967294, %s861_s16   ;;  %s861_s16 = sphi %s931_s16, %s22_s16   ;;  %s857_s15 = sphi %s929_s15, %s1112_s15   ;;  %s853_s14 = sphi %s927_s14, %s1111_s14   ;;  %s849_s13 = sphi %s925_s13, %s1110_s13   ;;  %s845_s12 = sphi %s923_s12, %s1109_s12   ;;  %s841_s11 = sphi %s921_s11, %s1108_s11   ;;  %s837_s10 = sphi %s919_s10, %s1107_s10   ;;  %s833_s30 = sphi %s917_s30, %s1106_s30  }
   0xa   : > { %s31_s19 = sadd.s32 1, %s853_s14  ;;  %s34_s20 = sadd.s32 1, %s857_s15 }
   0xb   : > { %p32_p0 = scmp.ge.s32.totalorder %s31_s19, 2  ;;  %p249_p1 = scmp.ne.s32.totalorder %s841_s11, %s837_s10 }
   0xc   : > { %p250_p2 = scmp.eq.s32.totalorder %s651_s17, 3  ;;  %p255_p5 = scmp.ne.s32.totalorder %s837_s10, %s833_s30 }
   0xd   : > { %s1114_s19 = smov (%p32_p0, %s31_s19), 0  ;;  %s1116_s20 = smov (!%p32_p0, %s34_s20), %s857_s15 }
   0xe   : > { %s235_s21 = ssub.s32 %s853_s14, %s1114_s19  ;;  %p968_p3 = por %p250_p2, %p249_p1 }
   0xf   : > { %p36_p4 = scmp.ge.s32.totalorder %s1116_s20, 2  ;;  %p256_p6 = scmp.eq.s32.totalorder %s652_s18, 3 }
  0x10   : > { %p655_p7 = scmp.ge.s32.totalorder %s861_s16, 1  ;;  %p309_p9 = scmp.lt.s32.totalorder %s861_s16, 5 }
  0x11   : > { %s1118_s20 = smov (%p36_p4, %s1116_s20), 0  ;;  %p977_p8 = por %p256_p6, %p255_p5 }
  0x12   : > { %1100 = sst [smem:[#allocation5_spill]] %s1118_s20  ;;  %s234_s24 = ssub.s32 %s857_s15, %s1118_s20 }
  0x13   : > { %s239_s25 = sadd.s32 1, %s841_s11  ;;  %s236_s26 = sor.u32 %s235_s21, %s234_s24 }
  0x14   : > { %p310_p10 = pnand %p655_p7, %p309_p9  ;;  %p237_p11 = scmp.eq.s32.totalorder %s236_s26, 0 }
  0x15   : > { %s1102_s1 = sld [smem:[#allocation6_spill]] (!%p310_p10)  ;;  %p348_p12 = scmp.lt.s32.totalorder (!%p310_p10), %s849_s13, 1 }
  0x16   : > { %s986_s27 = scalar_select %p237_p11, %s841_s11, %s239_s25  }
  0x17   : > { %313 = sbr.rel (%p310_p10) target bundleno = 578 (0x242), region = 56  ;;  %s1103_s2 = sld [smem:[#allocation7_spill]] (!%p310_p10) }
  0x18   : > { %s1104_s8 = sld [smem:[#allocation8_spill]] (!%p310_p10)  ;;  %p350_p13 = scmp.lt.s32.totalorder (!%p310_p10), %s845_s12, 1 }
  0x19   : > { %s345_s28 = sand.u32 (!%p310_p10), 1, %s837_s10   ;;  %s866_s25 = smov (!%p310_p10), [#allocation2]  }
  0x1a   : > { %s656_s29 = sshll.u32 (!%p310_p10), %s345_s28, 2  ;;  %s773_s26 = sshll.u32 (!%p310_p10), %s866_s25, 4  ;;  %s774_s26 = int_to_ptr.vmem [resolvable:$false] %s773_s26 }
  0x1c   : > { %v381_v0 = vld [vmem:[%s1102_s1] sm:$0xf]  ;;  %v863_v1 = vmov 0   ;;  %v864_v3 = vmov 0.0   ;;  %vm865_vm0 = vmmov 0   ;;  %s349_s17 = scalar_select %p348_p12, %s849_s13, 1 }
  0x1d   : > { %765 = vset.pattern.permute.xlu0 %v863_v1  ;;  %766 = vset.pattern.permute.xlu1 %v863_v1  ;;  %v388_v2 = vld [vmem:[%s1103_s2] sm:$0xf]  ;;  %s351_s18 = scalar_select %p350_p13, %s845_s12, 1  ;;  %vm358_vm1 = vcmask 1043456   ;;  %vm407_vm2 = vcmask 1041408   ;;  %vm403_vm3 = vcmask 31744  }
  0x1e   : > { %384 = vperm.xlu0 %765, %v381_v0   ;;  %673 = vmatprep.subr.bf16.mxu0 %v864_v3  ;;  %v504_v4 = vld [vmem:[%s1104_s8] sm:$0xf]  ;;  %s657_s21 = sshll.u32 %s349_s17, 1  ;;  %s663_s17 = sshll.u32 %s849_s13, 1 }
  0x1f   : > { %679 = vmatprep.subr.bf16.mxu1 %v864_v3  ;;  %675 = vmatprep.mubr.msk.bf16.mxu0 %vm865_vm0, %v864_v3  ;;  %v397_v5 = vld [vmem:[%s1089_s4] sm:$0xf]  ;;  %s353_s24 = sadd.s32 %s657_s21, %s351_s18  ;;  %s569_s18 = sadd.s32 %s845_s12, %s663_s17 }
  0x20   : > { %681 = vmatprep.mubr.msk.bf16.mxu1 %vm865_vm0, %v864_v3  ;;  %400 = vperm.xlu1 %766, %v397_v5   ;;  %v452_v6 = vld [vmem:[%s1091_s6] sm:$0xf]  ;;  %s658_s1 = sshll.u32 %s353_s24, 2  ;;  %s664_s21 = sshll.u32 %s569_s18, 6 }
  0x21   : > { %s355_s20 = scalar_lea.vmem %s1085_s0, %s658_s1  ;;  %v396_v35 = vld [vmem:[%s1088_s3] sm:$0x3]  ;;  %s347_s24 = scalar_lea.vmem [#allocation2], %s656_s29 }
  0x22   : > { %391 = vperm.xlu0 %765, %v388_v2   ;;  %v357_v7 = vld [vmem:[%s355_s20] sm:$0xf]  ;;  %s573_s1 = sshll.u32 %s347_s24, 4  ;;  %s1033_s20 = scalar_lea.hbm %s1094_s9, %s664_s21  ;;  %s1035_s1 = int_to_ptr.vmem [resolvable:$true] %s573_s1 }
  0x23   : > { %v359_v8 = vsel %vm358_vm1, %v357_v7, 0.0  ;;  %v451_v36 = vld [vmem:[%s1090_s5] sm:$0x3]  ;;  %s558_s12 = scalar_lea.sflag [#allocation3], %s345_s28  ;;  %s769_s13 = scalar_lea.vmem %s1035_s1, 64 }
  0x24   : > { %455 = vperm.xlu1 %766, %v452_v6   ;;  %v360_v9 = vrot.slane %v359_v8, 4  ;;  %v502_v52 = vld [vmem:[%s1092_s7] sm:$0x3]  ;;  %p770_p0 = scmp.ne.s32.totalorder %s1035_s1, %s769_s13  ;;  %s775_s29 = scalar_lea.vmem %s774_s26, 128 }
  0x25   : > { %p776_p4 = scmp.lt.s32.totalorder %s1035_s1, %s774_s26  ;;  %p777_p5 = scmp.lt.s32.totalorder %s775_s29, %s769_s13 }
  0x26   : > { %507 = vperm.xlu0 %765, %v504_v4   ;;  %v361_v10 = vadd.f32 %v360_v9, %v359_v8  ;;  %p771_p1 = pnand %p770_p0, %p968_p3 }
  0x27   : > { %p778_p6 = por %p777_p5, %p776_p4 }
  0x28   : > { %v362_v11 = vrot.slane %v361_v10, 2  ;;  %p772_p2 = pneg %p771_p1 }
  0x2a   : > { %v363_v12 = vadd.f32 %v362_v11, %v361_v10  ;;  %p779_p7 = pnand %p778_p6, %p772_p2 }
  0x2c   : > { %v364_v13 = vrot.slane %v363_v12, 1 }
  0x2e   : > { %v365_v14 = vadd.f32 %v364_v13, %v363_v12 }
  0x30   : > { %v367_v15 = vmul.f32 0.25, %v365_v14 }
  0x32   : > { %v368_v16 = vsub.f32 %v357_v7, %v367_v15 }
  0x34   : > { %v369_v17 = vmul.f32 %v368_v16, %v368_v16 }
  0x36   : > { %v370_v18 = vsel %vm358_vm1, %v369_v17, 0.0 }
  0x37   : > { %v371_v19 = vrot.slane %v370_v18, 4 }
  0x39   : > { %v372_v20 = vadd.f32 %v371_v19, %v370_v18 }
  0x3b   : > { %v373_v21 = vrot.slane %v372_v20, 2 }
  0x3d   : > { %v374_v22 = vadd.f32 %v373_v21, %v372_v20 }
  0x3f   : > { %v375_v23 = vrot.slane %v374_v22, 1 }
  0x41   : > { %v376_v24 = vadd.f32 %v375_v23, %v374_v22 }
  0x43   : > { %v377_v25 = vmul.f32 0.25, %v376_v24 }
  0x45   : > { %v378_v26 = vadd.f32 1e-06, %v377_v25 }
  0x47   : > { %767 = vrsqrt.f32 %v378_v26 }
  0x54   : > { %v768_v27 = vpop.eup %767 }
  0x55   : > { %v380_v28 = vmul.f32 %v768_v27, %v368_v16 }
  0x99   : > { %v385_v29 = vpop.permute.xlu0 %384 }
  0x9a   : > { %v387_v30 = vmul.f32 %v385_v29, %v380_v28 }
  0x9b   : > { %v401_v37 = vpop.permute.xlu1 %400 }
  0x9d   : > { %v392_v31 = vpop.permute.xlu0 %391 }
  0x9e   : > { %v394_v32 = vadd.f32 %v392_v31, %v387_v30 }
  0x9f   : > { %v456_v38 = vpop.permute.xlu1 %455 }
  0xa0   : > { %v395_v33 = vpack.c.bf16 %v394_v32, %v394_v32 }
  0xa1   : > { %v508_v53 = vpop.permute.xlu0 %507 }
  0xa2   : > { %v409_v34 = vsel %vm407_vm2, %v395_v33, 0 }
  0xa3   : > { %674 = vmatpush3.bf16.msra.mxu0 %v409_v34  ;;  %680 = vmatpush3.bf16.msra.mxu1 %v409_v34 }
  0xa4   : > { %685 = vmatprep.subr.bf16.mxu0 %v864_v3 }
  0xa6   : > { %676 = vmatmul.mubr.msk.bf16.vlgmr.msra.gmra.mxu0 %vm403_vm3, %v396_v35  ;;  %682 = vmatmul.mubr.msk.bf16.vlgmr.msra.gmra.mxu1 %vm403_vm3, %v451_v36 }
  0xa7   : > { %687 = vmatprep.mubr.msk.bf16.mxu0 %vm865_vm0, %v864_v3 }
 0x166   : > { %v445_v39 = vpop.f32.mrf.mxu0  ;;  %v495_v40 = vpop.f32.mrf.mxu1 }
 0x167   : > { %v446_v41 = vadd.f32 %v445_v39, %v401_v37  ;;  %v496_v42 = vadd.f32 %v495_v40, %v456_v38 }
 0x168   : > { %v677_v43 = vpop.f32.mrf.mxu0  ;;  %v683_v44 = vpop.f32.mrf.mxu1 }
 0x169   : > { %v501_v45 = vmul.f32 %v496_v42, %v446_v41 }
 0x16a   : > { %v448_v46 = vpop.f32.mrf.mxu0  ;;  %v498_v47 = vpop.f32.mrf.mxu1 }
 0x16b   : > { %v503_v48 = vpack.c.bf16 %v501_v45, %v501_v45 }
 0x16c   : > { %v678_v49 = vpop.f32.mrf.mxu0  ;;  %v684_v50 = vpop.f32.mrf.mxu1 }
 0x16d   : > { %v514_v51 = vsel %vm407_vm2, %v503_v48, 0 }
 0x16e   : > { %686 = vmatpush3.bf16.msra.mxu0 %v514_v51 }
 0x171   : > { %688 = vmatmul.mubr.msk.bf16.vlgmr.msra.gmra.mxu0 %vm403_vm3, %v502_v52 }
 0x231   : > { %v550_v54 = vpop.f32.mrf.mxu0 }
 0x232   : > { %v551_v55 = vadd.f32 %v550_v54, %v508_v53 }
 0x233   : > { %v689_v56 = vpop.f32.mrf.mxu0 }
 0x234   : > { %556 = vst [vmem:[%s347_s24] sm:$0xf] %v551_v55 }
 0x235   : > { %v553_v57 = vpop.f32.mrf.mxu0 }
 0x236   : > { %782 = shalt.err (!%p779_p7)
}
 0x237   : > { %s783_s17 = scalar_lea.hbm %s1033_s20, 64  ;;  %s787_s21 = scalar_lea.hbm %s1094_s9, 256 }
 0x238   : > { %p784_p9 = scmp.ne.s32.totalorder %s1033_s20, %s783_s17  ;;  %p788_p12 = scmp.lt.s32.totalorder %s1033_s20, %s1094_s9 }
 0x239   : > { %p789_p13 = scmp.lt.s32.totalorder %s787_s21, %s783_s17 }
 0x23a   : > { %p785_p10 = pnand %p784_p9, %p968_p3 }
 0x23b   : > { %p790_p0 = por %p789_p13, %p788_p12 }
 0x23c   : > { %p786_p11 = pneg %p785_p10 }
 0x23e   : > { %p791_p1 = pnand %p790_p0, %p786_p11 }
 0x240   : > { %794 = shalt.err (!%p791_p1)
}
 0x241   : > { %691 = dma.vmem_to_hbm [thread:$0]  (%p968_p3), %s1035_s1, 64, %s1033_s20, %s558_s12   ;;  %v690_v58 = vpop.f32.mrf.mxu0 }
 0x242 PF: > { %p697_p2 = scmp.ge.s32.totalorder %s861_s16, 2  ;;  %s585_s8 = sand.u32 1, %s833_s30  }
 0x243   : > { %s586_s13 = scalar_lea.sflag [#allocation3], %s585_s8 }
 0x244   : > { %p694_p4 = pnand %p697_p2, %p977_p8 }
 0x246   : > { %p695_p5 = pneg %p694_p4 }
 0x248   : > { %828 = dma.done.wait (%p695_p5), %s586_s13, 64  }
 0x249   : > { %830 = vsyncadd (%p695_p5), %s586_s13, 4294967232  ;;  %s22_s16 = sadd.s32 1, %s861_s16   ;;  %s1105_s22 = sld [smem:[#allocation5_spill]] }
 0x24a   : > { %p19_p6 = scmp.ge.s32.totalorder %s22_s16, 6   ;;  %s1106_s30 = smov %s837_s10 }
 0x24b   : > { %s1107_s10 = smov %s841_s11  ;;  %s1108_s11 = smov %s986_s27 }
 0x24c   : > { %s1109_s12 = smov %s853_s14  ;;  %s1110_s13 = smov %s857_s15 }
 0x24d   : > { %s1111_s14 = smov %s1114_s19  ;;  %21 = sbr.rel (!%p19_p6) target bundleno = 9 (0x9), region = 91 }
 0x24f   : > { %s1112_s15 = smov %s1105_s22 }
 0x252   :  { %591 = vsyncpa [#allocation3], 1 }
 0x253   :  { %593 = vsyncpa [#allocation3 + $0x1], 1 }

</bundles_post_ra>
